<compile_context>
chip_gen: v5e
topology: v5e:2x2
jax: 0.10.0
libtpu: 0.0.40
codegen_flags: <defaults>
</compile_context>

<pallas_src>
import jax
import jax.numpy as jnp
from jax.experimental import pallas as pl
from jax.experimental.pallas import tpu as pltpu


def _round_up(x, m):
    return ((x + m - 1) // m) * m


def _char_decoder_kernel(ids_ref, h0_ref, c0_ref, emb_ref, wih_ref, whh_ref,
                         b_ref, wout_ref, bout_ref,
                         scores_ref, hout_ref, cout_ref,
                         gx_scr, hall_scr):
    LB = ids_ref.shape[0]
    Bp, H = h0_ref.shape
    L = LB // Bp
    V_pad = emb_ref.shape[0]

    # ---- Fused embedding gather: one-hot build (VPU) + row-select matmul (MXU).
    lane_v = jax.lax.broadcasted_iota(jnp.int32, (LB, V_pad), 1)
    one_hot = jnp.where(ids_ref[...] == lane_v, 1.0, 0.0).astype(jnp.bfloat16)
    # Exact row selection of bf16 embedding rows (f32 accumulation).
    y = jnp.dot(one_hot, emb_ref[...], preferred_element_type=jnp.float32)

    # ---- Batched input transform for all timesteps (off the serial path).
    gx = jnp.dot(y.astype(jnp.bfloat16), wih_ref[...],
                 preferred_element_type=jnp.float32) + b_ref[...]       # (LB, 4H)

    # sigmoid(x) = 0.5*tanh(x/2) + 0.5: pre-halve the i/f/o gate columns so the
    # recurrence needs a single tanh of the full (Bp, 4H) vreg per step.
    lane_g = jax.lax.broadcasted_iota(jnp.int32, (1, 4 * H), 1)
    is_g = jnp.logical_and(lane_g >= 2 * H, lane_g < 3 * H)
    gate_scale = jnp.where(is_g, 1.0, 0.5)                              # (1, 4H) f32
    gx_scr[...] = gx * gate_scale                                       # park in VMEM
    whh_s = (whh_ref[...] * gate_scale).astype(jnp.bfloat16)            # x0.5 exact in bf16

    h = h0_ref[...]                       # (Bp, H) f32 (final-state precision)
    c = c0_ref[...]                       # (Bp, H) f32
    h_bf = h.astype(jnp.bfloat16)         # value the recurrence actually consumes

    # Static in-kernel recurrence (L small and known at trace time).
    for t in range(L):
        gates = gx_scr[t * Bp:(t + 1) * Bp, :] + jnp.dot(
            h_bf, whh_s, preferred_element_type=jnp.float32)            # (Bp, 4H)
        tg = jnp.tanh(gates)              # ONE EUP transcendental per step
        i_g = 0.5 * tg[:, 0 * H:1 * H] + 0.5
        f_g = 0.5 * tg[:, 1 * H:2 * H] + 0.5
        g_g = tg[:, 2 * H:3 * H]
        o_g = 0.5 * tg[:, 3 * H:4 * H] + 0.5
        c = f_g * c + i_g * g_g                                          # f32 state
        h = o_g * jnp.tanh(c)
        h_bf = h.astype(jnp.bfloat16)     # single cast, reused for matmul + store
        hall_scr[t * Bp:(t + 1) * Bp, :] = h_bf

    # ---- Single batched, lane-dense vocab projection: (L*B, H) @ (H, V_pad).
    scores_ref[...] = jnp.dot(hall_scr[...], wout_ref[...],
                              preferred_element_type=jnp.float32) + bout_ref[...]

    # Final LSTM state written exactly once (f32).
    hout_ref[...] = h
    cout_ref[...] = c


def prepare_params(params):
    """One-time padding / bf16 casting of parameters into kernel-ready form."""
    emb, wih, whh, b = params["emb"], params["wih"], params["whh"], params["b"]
    wout, bout = params["wout"], params["bout"]
    V, E = emb.shape
    H = whh.shape[0]
    E_pad = _round_up(max(E, 128), 128)     # lane-dense embedding / W_ih K dim
    V_pad = _round_up(max(V, 128), 128)     # lane-dense one-hot + scores

    emb_p = jnp.zeros((V_pad, E_pad), jnp.bfloat16).at[:V, :E].set(
        emb.astype(jnp.bfloat16))
    wih_p = jnp.zeros((E_pad, 4 * H), jnp.bfloat16).at[:E, :].set(
        wih.astype(jnp.bfloat16))
    whh_p = whh.astype(jnp.bfloat16)
    wout_p = jnp.zeros((H, V_pad), jnp.bfloat16).at[:, :V].set(
        wout.astype(jnp.bfloat16))
    bout_p = jnp.zeros((1, V_pad), jnp.float32).at[:, :V].set(
        bout.astype(jnp.float32))
    return dict(emb=emb_p, wih=wih_p, whh=whh_p, b=b.astype(jnp.float32),
                wout=wout_p, bout=bout_p, H=H, V=V, V_pad=V_pad, E_pad=E_pad)


def char_decoder_forward(input_ids, kparams, dec_hidden=None):
    """Mirrors CharDecoder.forward.

    input_ids : (L, B) int32
    kparams   : output of prepare_params()
    dec_hidden: optional tuple (h, c), each (1, B, H)
    returns   : scores (L, B, V) f32, (h, c) each (1, B, H) f32
    """
    H, V, V_pad = kparams["H"], kparams["V"], kparams["V_pad"]
    L, B = input_ids.shape
    B_pad = max(8, _round_up(B, 8))

    # Only remaining wrapper glue: tiny int pad/reshape of the ids.
    ids = input_ids.astype(jnp.int32)
    if B_pad != B:
        ids = jnp.pad(ids, ((0, 0), (0, B_pad - B)))
    ids2d = ids.reshape(L * B_pad, 1)

    if dec_hidden is None:
        h0 = jnp.zeros((B_pad, H), jnp.float32)
        c0 = jnp.zeros((B_pad, H), jnp.float32)
    else:
        h0 = dec_hidden[0][0].astype(jnp.float32)
        c0 = dec_hidden[1][0].astype(jnp.float32)
        if B_pad != B:
            h0 = jnp.pad(h0, ((0, B_pad - B), (0, 0)))
            c0 = jnp.pad(c0, ((0, B_pad - B), (0, 0)))

    scores2d, h_fin, c_fin = pl.pallas_call(
        _char_decoder_kernel,
        out_shape=(
            jax.ShapeDtypeStruct((L * B_pad, V_pad), jnp.float32),  # scores slab
            jax.ShapeDtypeStruct((B_pad, H), jnp.float32),          # final h
            jax.ShapeDtypeStruct((B_pad, H), jnp.float32),          # final c
        ),
        scratch_shapes=[
            pltpu.VMEM((L * B_pad, 4 * H), jnp.float32),            # gx slab
            pltpu.VMEM((L * B_pad, H), jnp.bfloat16),               # h_t slab (bf16)
        ],
    )(ids2d, h0, c0, kparams["emb"], kparams["wih"], kparams["whh"],
      kparams["b"], kparams["wout"], kparams["bout"])

    scores = scores2d.reshape(L, B_pad, V_pad)[:, :B, :V]
    return scores, (h_fin[:B][None, :, :], c_fin[:B][None, :, :])


def _reference_forward(input_ids, params, dec_hidden):
    """Pure-JAX reference matching the PyTorch module semantics (f32)."""
    emb, wih, whh, b = params["emb"], params["wih"], params["whh"], params["b"]
    wout, bout = params["wout"], params["bout"]
    Y = jnp.take(emb, input_ids, axis=0).astype(jnp.float32)
    H = whh.shape[0]
    h, c = dec_hidden[0][0], dec_hidden[1][0]

    def step(carry, y_t):
        h, c = carry
        gates = y_t @ wih + h @ whh + b[0]
        i_g = jax.nn.sigmoid(gates[:, 0 * H:1 * H])
        f_g = jax.nn.sigmoid(gates[:, 1 * H:2 * H])
        g_g = jnp.tanh(gates[:, 2 * H:3 * H])
        o_g = jax.nn.sigmoid(gates[:, 3 * H:4 * H])
        c_new = f_g * c + i_g * g_g
        h_new = o_g * jnp.tanh(c_new)
        s = h_new @ wout + bout[0]
        return (h_new, c_new), s

    (h_fin, c_fin), scores = jax.lax.scan(step, (h, c), Y)
    return scores, (h_fin[None], c_fin[None])


def init_params(key, vocab_size, char_embedding_size, hidden_size,
                padding_index=0):
    kE, k1, k2, k3, k4, k5, k6 = jax.random.split(key, 7)
    H, E, V = hidden_size, char_embedding_size, vocab_size
    scale = 0.1
    emb = scale * jax.random.normal(kE, (V, E), jnp.float32)
    emb = emb.at[padding_index].set(0.0)        # nn.Embedding padding_idx row
    wih = scale * jax.random.normal(k1, (E, 4 * H), jnp.float32)
    whh = scale * jax.random.normal(k2, (H, 4 * H), jnp.float32)
    b_ih = scale * jax.random.normal(k3, (4 * H,), jnp.float32)
    b_hh = scale * jax.random.normal(k4, (4 * H,), jnp.float32)
    wout = scale * jax.random.normal(k5, (H, V), jnp.float32)
    bout = scale * jax.random.normal(k6, (1, V), jnp.float32)
    return dict(emb=emb, wih=wih, whh=whh, b=(b_ih + b_hh)[None, :],
                wout=wout, bout=bout)


if __name__ == "__main__":
    # Small shapes consistent with the module:
    #   length=8, batch=4, hidden_size=32, char_embedding_size=50, vocab=30
    L, B, H, E, V = 8, 4, 32, 50, 30
    key = jax.random.PRNGKey(0)
    k_ids, k_h, k_c, k_p = jax.random.split(key, 4)

    input_ids = jax.random.randint(k_ids, (L, B), 0, V, dtype=jnp.int32)
    h0 = 0.1 * jax.random.normal(k_h, (1, B, H), jnp.float32)
    c0 = 0.1 * jax.random.normal(k_c, (1, B, H), jnp.float32)
    params = init_params(k_p, V, E, H, padding_index=0)
    kparams = prepare_params(params)            # one-time kernel-ready params

    scores, (h_fin, c_fin) = char_decoder_forward(input_ids, kparams, (h0, c0))
    jax.block_until_ready((scores, h_fin, c_fin))

    # Sanity check against a pure-JAX f32 reference.
    ref_scores, (ref_h, ref_c) = _reference_forward(input_ids, params, (h0, c0))
    assert scores.shape == (L, B, V)
    assert h_fin.shape == (1, B, H) and c_fin.shape == (1, B, H)
    assert jnp.allclose(scores, ref_scores, atol=1e-2, rtol=1e-2)
    assert jnp.allclose(h_fin, ref_h, atol=1e-2, rtol=1e-2)
    assert jnp.allclose(c_fin, ref_c, atol=1e-2, rtol=1e-2)

    # TODO(synk): train_forward (cross-entropy loss) and decode_greedy
    # (string assembly over the vocab) involve host-side logic and are not
    # kernelized; forward() above is the reusable building block for both.

    print("KERNEL_OK")
</pallas_src>

<mosaic_0001>
module attributes {stable_mosaic.version = 11 : i64} {
  func.func @_char_decoder_kernel(%arg0: memref<64x1xi32, #tpu.memory_space<vmem>>, %arg1: memref<8x32xf32, #tpu.memory_space<vmem>>, %arg2: memref<8x32xf32, #tpu.memory_space<vmem>>, %arg3: memref<128x128xbf16, #tpu.memory_space<vmem>>, %arg4: memref<128x128xbf16, #tpu.memory_space<vmem>>, %arg5: memref<32x128xbf16, #tpu.memory_space<vmem>>, %arg6: memref<1x128xf32, #tpu.memory_space<vmem>>, %arg7: memref<32x128xbf16, #tpu.memory_space<vmem>>, %arg8: memref<1x128xf32, #tpu.memory_space<vmem>>, %arg9: memref<64x128xf32, #tpu.memory_space<vmem>>, %arg10: memref<8x32xf32, #tpu.memory_space<vmem>>, %arg11: memref<8x32xf32, #tpu.memory_space<vmem>>, %arg12: memref<64x128xf32, #tpu.memory_space<vmem>>, %arg13: memref<64x32xbf16, #tpu.memory_space<vmem>>) attributes {dimension_semantics = [], scalar_prefetch = 0 : i64, scratch_operands = 2 : i64, tpu.core_type = #tpu.core_type<tc>} {
    %0 = tpu.iota {dimensions = array<i32: 1>} : vector<64x128xi32>
    %c0 = arith.constant 0 : index
    %c0_0 = arith.constant 0 : index
    %1 = vector.load %arg0[%c0, %c0_0] : memref<64x1xi32, #tpu.memory_space<vmem>>, vector<64x1xi32>
    %2 = vector.broadcast %1 : vector<64x1xi32> to vector<64x128xi32>
    %3 = arith.cmpi eq, %2, %0 : vector<64x128xi32>
    %cst = arith.constant 1.000000e+00 : f32
    %cst_1 = arith.constant 0.000000e+00 : f32
    %4 = vector.broadcast %cst : f32 to vector<64x128xf32>
    %5 = vector.broadcast %cst_1 : f32 to vector<64x128xf32>
    %6 = arith.select %3, %4, %5 : vector<64x128xi1>, vector<64x128xf32>
    %7 = arith.truncf %6 : vector<64x128xf32> to vector<64x128xbf16>
    %c0_2 = arith.constant 0 : index
    %c0_3 = arith.constant 0 : index
    %8 = vector.load %arg3[%c0_2, %c0_3] : memref<128x128xbf16, #tpu.memory_space<vmem>>, vector<128x128xbf16>
    %cst_4 = arith.constant dense<0.000000e+00> : vector<64x128xf32>
    %9 = tpu.matmul %7, %8, %cst_4 {dimension_numbers = #tpu.dot_dimension_numbers<[1], [0], [0], [1], [0, 0, 1, 1], [], []>} : vector<64x128xbf16>, vector<128x128xbf16>, vector<64x128xf32> -> vector<64x128xf32>
    %10 = arith.truncf %9 : vector<64x128xf32> to vector<64x128xbf16>
    %c0_5 = arith.constant 0 : index
    %c0_6 = arith.constant 0 : index
    %11 = vector.load %arg4[%c0_5, %c0_6] : memref<128x128xbf16, #tpu.memory_space<vmem>>, vector<128x128xbf16>
    %cst_7 = arith.constant dense<0.000000e+00> : vector<64x128xf32>
    %12 = tpu.matmul %10, %11, %cst_7 {dimension_numbers = #tpu.dot_dimension_numbers<[1], [0], [0], [1], [0, 0, 1, 1], [], []>} : vector<64x128xbf16>, vector<128x128xbf16>, vector<64x128xf32> -> vector<64x128xf32>
    %c0_8 = arith.constant 0 : index
    %c0_9 = arith.constant 0 : index
    %13 = vector.load %arg6[%c0_8, %c0_9] : memref<1x128xf32, #tpu.memory_space<vmem>>, vector<1x128xf32>
    %14 = vector.broadcast %13 : vector<1x128xf32> to vector<64x128xf32>
    %15 = arith.addf %12, %14 : vector<64x128xf32>
    %16 = tpu.iota {dimensions = array<i32: 1>} : vector<1x128xi32>
    %c64_i32 = arith.constant 64 : i32
    %17 = vector.broadcast %c64_i32 : i32 to vector<1x128xi32>
    %18 = arith.cmpi sge, %16, %17 : vector<1x128xi32>
    %c96_i32 = arith.constant 96 : i32
    %19 = vector.broadcast %c96_i32 : i32 to vector<1x128xi32>
    %20 = arith.cmpi slt, %16, %19 : vector<1x128xi32>
    %21 = arith.andi %18, %20 : vector<1x128xi1>
    %cst_10 = arith.constant 1.000000e+00 : f32
    %cst_11 = arith.constant 5.000000e-01 : f32
    %22 = vector.broadcast %cst_10 : f32 to vector<1x128xf32>
    %23 = vector.broadcast %cst_11 : f32 to vector<1x128xf32>
    %24 = arith.select %21, %22, %23 : vector<1x128xi1>, vector<1x128xf32>
    %25 = vector.broadcast %24 : vector<1x128xf32> to vector<64x128xf32>
    %26 = arith.mulf %15, %25 : vector<64x128xf32>
    %c0_12 = arith.constant 0 : index
    %c0_13 = arith.constant 0 : index
    %27 = vector.load %arg12[%c0_12, %c0_13] : memref<64x128xf32, #tpu.memory_space<vmem>>, vector<64x128xf32>
    tpu.vector_store %arg12[%c0_12, %c0_13], %26 {strides = array<i32>} : memref<64x128xf32, #tpu.memory_space<vmem>>, vector<64x128xf32>,
    %c0_14 = arith.constant 0 : index
    %c0_15 = arith.constant 0 : index
    %28 = vector.load %arg5[%c0_14, %c0_15] : memref<32x128xbf16, #tpu.memory_space<vmem>>, vector<32x128xbf16>
    %29 = arith.truncf %24 : vector<1x128xf32> to vector<1x128xbf16>
    %30 = vector.broadcast %29 : vector<1x128xbf16> to vector<32x128xbf16>
    %31 = arith.mulf %28, %30 : vector<32x128xbf16>
    %c0_16 = arith.constant 0 : index
    %c0_17 = arith.constant 0 : index
    %32 = vector.load %arg1[%c0_16, %c0_17] : memref<8x32xf32, #tpu.memory_space<vmem>>, vector<8x32xf32>
    %c0_18 = arith.constant 0 : index
    %c0_19 = arith.constant 0 : index
    %33 = vector.load %arg2[%c0_18, %c0_19] : memref<8x32xf32, #tpu.memory_space<vmem>>, vector<8x32xf32>
    %34 = arith.truncf %32 : vector<8x32xf32> to vector<8x32xbf16>
    %c0_20 = arith.constant 0 : index
    %c0_21 = arith.constant 0 : index
    %35 = vector.load %arg12[%c0_20, %c0_21] : memref<64x128xf32, #tpu.memory_space<vmem>>, vector<8x128xf32>
    %cst_22 = arith.constant dense<0.000000e+00> : vector<8x128xf32>
    %36 = tpu.matmul %34, %31, %cst_22 {dimension_numbers = #tpu.dot_dimension_numbers<[1], [0], [0], [1], [0, 0, 1, 1], [], []>} : vector<8x32xbf16>, vector<32x128xbf16>, vector<8x128xf32> -> vector<8x128xf32>
    %37 = arith.addf %35, %36 : vector<8x128xf32>
    %38 = math.tanh %37 : vector<8x128xf32>
    %39 = vector.extract_strided_slice %38 {offsets = [0, 0], sizes = [8, 32], strides = [1, 1]} : vector<8x128xf32> to vector<8x32xf32>
    %cst_23 = arith.constant 5.000000e-01 : f32
    %40 = vector.broadcast %cst_23 : f32 to vector<8x32xf32>
    %41 = arith.mulf %40, %39 : vector<8x32xf32>
    %cst_24 = arith.constant 5.000000e-01 : f32
    %42 = vector.broadcast %cst_24 : f32 to vector<8x32xf32>
    %43 = arith.addf %41, %42 : vector<8x32xf32>
    %44 = vector.extract_strided_slice %38 {offsets = [0, 32], sizes = [8, 32], strides = [1, 1]} : vector<8x128xf32> to vector<8x32xf32>
    %cst_25 = arith.constant 5.000000e-01 : f32
    %45 = vector.broadcast %cst_25 : f32 to vector<8x32xf32>
    %46 = arith.mulf %45, %44 : vector<8x32xf32>
    %cst_26 = arith.constant 5.000000e-01 : f32
    %47 = vector.broadcast %cst_26 : f32 to vector<8x32xf32>
    %48 = arith.addf %46, %47 : vector<8x32xf32>
    %49 = vector.extract_strided_slice %38 {offsets = [0, 64], sizes = [8, 32], strides = [1, 1]} : vector<8x128xf32> to vector<8x32xf32>
    %50 = vector.extract_strided_slice %38 {offsets = [0, 96], sizes = [8, 32], strides = [1, 1]} : vector<8x128xf32> to vector<8x32xf32>
    %cst_27 = arith.constant 5.000000e-01 : f32
    %51 = vector.broadcast %cst_27 : f32 to vector<8x32xf32>
    %52 = arith.mulf %51, %50 : vector<8x32xf32>
    %cst_28 = arith.constant 5.000000e-01 : f32
    %53 = vector.broadcast %cst_28 : f32 to vector<8x32xf32>
    %54 = arith.addf %52, %53 : vector<8x32xf32>
    %55 = arith.mulf %48, %33 : vector<8x32xf32>
    %56 = arith.mulf %43, %49 : vector<8x32xf32>
    %57 = arith.addf %55, %56 : vector<8x32xf32>
    %58 = math.tanh %57 : vector<8x32xf32>
    %59 = arith.mulf %54, %58 : vector<8x32xf32>
    %60 = arith.truncf %59 : vector<8x32xf32> to vector<8x32xbf16>
    %c0_29 = arith.constant 0 : index
    %c0_30 = arith.constant 0 : index
    %61 = vector.load %arg13[%c0_29, %c0_30] : memref<64x32xbf16, #tpu.memory_space<vmem>>, vector<8x32xbf16>
    tpu.vector_store %arg13[%c0_29, %c0_30], %60 {strides = array<i32>} : memref<64x32xbf16, #tpu.memory_space<vmem>>, vector<8x32xbf16>,
    %c8 = arith.constant 8 : index
    %c0_31 = arith.constant 0 : index
    %62 = vector.load %arg12[%c8, %c0_31] : memref<64x128xf32, #tpu.memory_space<vmem>>, vector<8x128xf32>
    %cst_32 = arith.constant dense<0.000000e+00> : vector<8x128xf32>
    %63 = tpu.matmul %60, %31, %cst_32 {dimension_numbers = #tpu.dot_dimension_numbers<[1], [0], [0], [1], [0, 0, 1, 1], [], []>} : vector<8x32xbf16>, vector<32x128xbf16>, vector<8x128xf32> -> vector<8x128xf32>
    %64 = arith.addf %62, %63 : vector<8x128xf32>
    %65 = math.tanh %64 : vector<8x128xf32>
    %66 = vector.extract_strided_slice %65 {offsets = [0, 0], sizes = [8, 32], strides = [1, 1]} : vector<8x128xf32> to vector<8x32xf32>
    %cst_33 = arith.constant 5.000000e-01 : f32
    %67 = vector.broadcast %cst_33 : f32 to vector<8x32xf32>
    %68 = arith.mulf %67, %66 : vector<8x32xf32>
    %cst_34 = arith.constant 5.000000e-01 : f32
    %69 = vector.broadcast %cst_34 : f32 to vector<8x32xf32>
    %70 = arith.addf %68, %69 : vector<8x32xf32>
    %71 = vector.extract_strided_slice %65 {offsets = [0, 32], sizes = [8, 32], strides = [1, 1]} : vector<8x128xf32> to vector<8x32xf32>
    %cst_35 = arith.constant 5.000000e-01 : f32
    %72 = vector.broadcast %cst_35 : f32 to vector<8x32xf32>
    %73 = arith.mulf %72, %71 : vector<8x32xf32>
    %cst_36 = arith.constant 5.000000e-01 : f32
    %74 = vector.broadcast %cst_36 : f32 to vector<8x32xf32>
    %75 = arith.addf %73, %74 : vector<8x32xf32>
    %76 = vector.extract_strided_slice %65 {offsets = [0, 64], sizes = [8, 32], strides = [1, 1]} : vector<8x128xf32> to vector<8x32xf32>
    %77 = vector.extract_strided_slice %65 {offsets = [0, 96], sizes = [8, 32], strides = [1, 1]} : vector<8x128xf32> to vector<8x32xf32>
    %cst_37 = arith.constant 5.000000e-01 : f32
    %78 = vector.broadcast %cst_37 : f32 to vector<8x32xf32>
    %79 = arith.mulf %78, %77 : vector<8x32xf32>
    %cst_38 = arith.constant 5.000000e-01 : f32
    %80 = vector.broadcast %cst_38 : f32 to vector<8x32xf32>
    %81 = arith.addf %79, %80 : vector<8x32xf32>
    %82 = arith.mulf %75, %57 : vector<8x32xf32>
    %83 = arith.mulf %70, %76 : vector<8x32xf32>
    %84 = arith.addf %82, %83 : vector<8x32xf32>
    %85 = math.tanh %84 : vector<8x32xf32>
    %86 = arith.mulf %81, %85 : vector<8x32xf32>
    %87 = arith.truncf %86 : vector<8x32xf32> to vector<8x32xbf16>
    %c8_39 = arith.constant 8 : index
    %c0_40 = arith.constant 0 : index
    %88 = vector.load %arg13[%c8_39, %c0_40] : memref<64x32xbf16, #tpu.memory_space<vmem>>, vector<8x32xbf16>
    tpu.vector_store %arg13[%c8_39, %c0_40], %87 {strides = array<i32>} : memref<64x32xbf16, #tpu.memory_space<vmem>>, vector<8x32xbf16>,
    %c16 = arith.constant 16 : index
    %c0_41 = arith.constant 0 : index
    %89 = vector.load %arg12[%c16, %c0_41] : memref<64x128xf32, #tpu.memory_space<vmem>>, vector<8x128xf32>
    %cst_42 = arith.constant dense<0.000000e+00> : vector<8x128xf32>
    %90 = tpu.matmul %87, %31, %cst_42 {dimension_numbers = #tpu.dot_dimension_numbers<[1], [0], [0], [1], [0, 0, 1, 1], [], []>} : vector<8x32xbf16>, vector<32x128xbf16>, vector<8x128xf32> -> vector<8x128xf32>
    %91 = arith.addf %89, %90 : vector<8x128xf32>
    %92 = math.tanh %91 : vector<8x128xf32>
    %93 = vector.extract_strided_slice %92 {offsets = [0, 0], sizes = [8, 32], strides = [1, 1]} : vector<8x128xf32> to vector<8x32xf32>
    %cst_43 = arith.constant 5.000000e-01 : f32
    %94 = vector.broadcast %cst_43 : f32 to vector<8x32xf32>
    %95 = arith.mulf %94, %93 : vector<8x32xf32>
    %cst_44 = arith.constant 5.000000e-01 : f32
    %96 = vector.broadcast %cst_44 : f32 to vector<8x32xf32>
    %97 = arith.addf %95, %96 : vector<8x32xf32>
    %98 = vector.extract_strided_slice %92 {offsets = [0, 32], sizes = [8, 32], strides = [1, 1]} : vector<8x128xf32> to vector<8x32xf32>
    %cst_45 = arith.constant 5.000000e-01 : f32
    %99 = vector.broadcast %cst_45 : f32 to vector<8x32xf32>
    %100 = arith.mulf %99, %98 : vector<8x32xf32>
    %cst_46 = arith.constant 5.000000e-01 : f32
    %101 = vector.broadcast %cst_46 : f32 to vector<8x32xf32>
    %102 = arith.addf %100, %101 : vector<8x32xf32>
    %103 = vector.extract_strided_slice %92 {offsets = [0, 64], sizes = [8, 32], strides = [1, 1]} : vector<8x128xf32> to vector<8x32xf32>
    %104 = vector.extract_strided_slice %92 {offsets = [0, 96], sizes = [8, 32], strides = [1, 1]} : vector<8x128xf32> to vector<8x32xf32>
    %cst_47 = arith.constant 5.000000e-01 : f32
    %105 = vector.broadcast %cst_47 : f32 to vector<8x32xf32>
    %106 = arith.mulf %105, %104 : vector<8x32xf32>
    %cst_48 = arith.constant 5.000000e-01 : f32
    %107 = vector.broadcast %cst_48 : f32 to vector<8x32xf32>
    %108 = arith.addf %106, %107 : vector<8x32xf32>
    %109 = arith.mulf %102, %84 : vector<8x32xf32>
    %110 = arith.mulf %97, %103 : vector<8x32xf32>
    %111 = arith.addf %109, %110 : vector<8x32xf32>
    %112 = math.tanh %111 : vector<8x32xf32>
    %113 = arith.mulf %108, %112 : vector<8x32xf32>
    %114 = arith.truncf %113 : vector<8x32xf32> to vector<8x32xbf16>
    %c16_49 = arith.constant 16 : index
    %c0_50 = arith.constant 0 : index
    %115 = vector.load %arg13[%c16_49, %c0_50] : memref<64x32xbf16, #tpu.memory_space<vmem>>, vector<8x32xbf16>
    tpu.vector_store %arg13[%c16_49, %c0_50], %114 {strides = array<i32>} : memref<64x32xbf16, #tpu.memory_space<vmem>>, vector<8x32xbf16>,
    %c24 = arith.constant 24 : index
    %c0_51 = arith.constant 0 : index
    %116 = vector.load %arg12[%c24, %c0_51] : memref<64x128xf32, #tpu.memory_space<vmem>>, vector<8x128xf32>
    %cst_52 = arith.constant dense<0.000000e+00> : vector<8x128xf32>
    %117 = tpu.matmul %114, %31, %cst_52 {dimension_numbers = #tpu.dot_dimension_numbers<[1], [0], [0], [1], [0, 0, 1, 1], [], []>} : vector<8x32xbf16>, vector<32x128xbf16>, vector<8x128xf32> -> vector<8x128xf32>
    %118 = arith.addf %116, %117 : vector<8x128xf32>
    %119 = math.tanh %118 : vector<8x128xf32>
    %120 = vector.extract_strided_slice %119 {offsets = [0, 0], sizes = [8, 32], strides = [1, 1]} : vector<8x128xf32> to vector<8x32xf32>
    %cst_53 = arith.constant 5.000000e-01 : f32
    %121 = vector.broadcast %cst_53 : f32 to vector<8x32xf32>
    %122 = arith.mulf %121, %120 : vector<8x32xf32>
    %cst_54 = arith.constant 5.000000e-01 : f32
    %123 = vector.broadcast %cst_54 : f32 to vector<8x32xf32>
    %124 = arith.addf %122, %123 : vector<8x32xf32>
    %125 = vector.extract_strided_slice %119 {offsets = [0, 32], sizes = [8, 32], strides = [1, 1]} : vector<8x128xf32> to vector<8x32xf32>
    %cst_55 = arith.constant 5.000000e-01 : f32
    %126 = vector.broadcast %cst_55 : f32 to vector<8x32xf32>
    %127 = arith.mulf %126, %125 : vector<8x32xf32>
    %cst_56 = arith.constant 5.000000e-01 : f32
    %128 = vector.broadcast %cst_56 : f32 to vector<8x32xf32>
    %129 = arith.addf %127, %128 : vector<8x32xf32>
    %130 = vector.extract_strided_slice %119 {offsets = [0, 64], sizes = [8, 32], strides = [1, 1]} : vector<8x128xf32> to vector<8x32xf32>
    %131 = vector.extract_strided_slice %119 {offsets = [0, 96], sizes = [8, 32], strides = [1, 1]} : vector<8x128xf32> to vector<8x32xf32>
    %cst_57 = arith.constant 5.000000e-01 : f32
    %132 = vector.broadcast %cst_57 : f32 to vector<8x32xf32>
    %133 = arith.mulf %132, %131 : vector<8x32xf32>
    %cst_58 = arith.constant 5.000000e-01 : f32
    %134 = vector.broadcast %cst_58 : f32 to vector<8x32xf32>
    %135 = arith.addf %133, %134 : vector<8x32xf32>
    %136 = arith.mulf %129, %111 : vector<8x32xf32>
    %137 = arith.mulf %124, %130 : vector<8x32xf32>
    %138 = arith.addf %136, %137 : vector<8x32xf32>
    %139 = math.tanh %138 : vector<8x32xf32>
    %140 = arith.mulf %135, %139 : vector<8x32xf32>
    %141 = arith.truncf %140 : vector<8x32xf32> to vector<8x32xbf16>
    %c24_59 = arith.constant 24 : index
    %c0_60 = arith.constant 0 : index
    %142 = vector.load %arg13[%c24_59, %c0_60] : memref<64x32xbf16, #tpu.memory_space<vmem>>, vector<8x32xbf16>
    tpu.vector_store %arg13[%c24_59, %c0_60], %141 {strides = array<i32>} : memref<64x32xbf16, #tpu.memory_space<vmem>>, vector<8x32xbf16>,
    %c32 = arith.constant 32 : index
    %c0_61 = arith.constant 0 : index
    %143 = vector.load %arg12[%c32, %c0_61] : memref<64x128xf32, #tpu.memory_space<vmem>>, vector<8x128xf32>
    %cst_62 = arith.constant dense<0.000000e+00> : vector<8x128xf32>
    %144 = tpu.matmul %141, %31, %cst_62 {dimension_numbers = #tpu.dot_dimension_numbers<[1], [0], [0], [1], [0, 0, 1, 1], [], []>} : vector<8x32xbf16>, vector<32x128xbf16>, vector<8x128xf32> -> vector<8x128xf32>
    %145 = arith.addf %143, %144 : vector<8x128xf32>
    %146 = math.tanh %145 : vector<8x128xf32>
    %147 = vector.extract_strided_slice %146 {offsets = [0, 0], sizes = [8, 32], strides = [1, 1]} : vector<8x128xf32> to vector<8x32xf32>
    %cst_63 = arith.constant 5.000000e-01 : f32
    %148 = vector.broadcast %cst_63 : f32 to vector<8x32xf32>
    %149 = arith.mulf %148, %147 : vector<8x32xf32>
    %cst_64 = arith.constant 5.000000e-01 : f32
    %150 = vector.broadcast %cst_64 : f32 to vector<8x32xf32>
    %151 = arith.addf %149, %150 : vector<8x32xf32>
    %152 = vector.extract_strided_slice %146 {offsets = [0, 32], sizes = [8, 32], strides = [1, 1]} : vector<8x128xf32> to vector<8x32xf32>
    %cst_65 = arith.constant 5.000000e-01 : f32
    %153 = vector.broadcast %cst_65 : f32 to vector<8x32xf32>
    %154 = arith.mulf %153, %152 : vector<8x32xf32>
    %cst_66 = arith.constant 5.000000e-01 : f32
    %155 = vector.broadcast %cst_66 : f32 to vector<8x32xf32>
    %156 = arith.addf %154, %155 : vector<8x32xf32>
    %157 = vector.extract_strided_slice %146 {offsets = [0, 64], sizes = [8, 32], strides = [1, 1]} : vector<8x128xf32> to vector<8x32xf32>
    %158 = vector.extract_strided_slice %146 {offsets = [0, 96], sizes = [8, 32], strides = [1, 1]} : vector<8x128xf32> to vector<8x32xf32>
    %cst_67 = arith.constant 5.000000e-01 : f32
    %159 = vector.broadcast %cst_67 : f32 to vector<8x32xf32>
    %160 = arith.mulf %159, %158 : vector<8x32xf32>
    %cst_68 = arith.constant 5.000000e-01 : f32
    %161 = vector.broadcast %cst_68 : f32 to vector<8x32xf32>
    %162 = arith.addf %160, %161 : vector<8x32xf32>
    %163 = arith.mulf %156, %138 : vector<8x32xf32>
    %164 = arith.mulf %151, %157 : vector<8x32xf32>
    %165 = arith.addf %163, %164 : vector<8x32xf32>
    %166 = math.tanh %165 : vector<8x32xf32>
    %167 = arith.mulf %162, %166 : vector<8x32xf32>
    %168 = arith.truncf %167 : vector<8x32xf32> to vector<8x32xbf16>
    %c32_69 = arith.constant 32 : index
    %c0_70 = arith.constant 0 : index
    %169 = vector.load %arg13[%c32_69, %c0_70] : memref<64x32xbf16, #tpu.memory_space<vmem>>, vector<8x32xbf16>
    tpu.vector_store %arg13[%c32_69, %c0_70], %168 {strides = array<i32>} : memref<64x32xbf16, #tpu.memory_space<vmem>>, vector<8x32xbf16>,
    %c40 = arith.constant 40 : index
    %c0_71 = arith.constant 0 : index
    %170 = vector.load %arg12[%c40, %c0_71] : memref<64x128xf32, #tpu.memory_space<vmem>>, vector<8x128xf32>
    %cst_72 = arith.constant dense<0.000000e+00> : vector<8x128xf32>
    %171 = tpu.matmul %168, %31, %cst_72 {dimension_numbers = #tpu.dot_dimension_numbers<[1], [0], [0], [1], [0, 0, 1, 1], [], []>} : vector<8x32xbf16>, vector<32x128xbf16>, vector<8x128xf32> -> vector<8x128xf32>
    %172 = arith.addf %170, %171 : vector<8x128xf32>
    %173 = math.tanh %172 : vector<8x128xf32>
    %174 = vector.extract_strided_slice %173 {offsets = [0, 0], sizes = [8, 32], strides = [1, 1]} : vector<8x128xf32> to vector<8x32xf32>
    %cst_73 = arith.constant 5.000000e-01 : f32
    %175 = vector.broadcast %cst_73 : f32 to vector<8x32xf32>
    %176 = arith.mulf %175, %174 : vector<8x32xf32>
    %cst_74 = arith.constant 5.000000e-01 : f32
    %177 = vector.broadcast %cst_74 : f32 to vector<8x32xf32>
    %178 = arith.addf %176, %177 : vector<8x32xf32>
    %179 = vector.extract_strided_slice %173 {offsets = [0, 32], sizes = [8, 32], strides = [1, 1]} : vector<8x128xf32> to vector<8x32xf32>
    %cst_75 = arith.constant 5.000000e-01 : f32
    %180 = vector.broadcast %cst_75 : f32 to vector<8x32xf32>
    %181 = arith.mulf %180, %179 : vector<8x32xf32>
    %cst_76 = arith.constant 5.000000e-01 : f32
    %182 = vector.broadcast %cst_76 : f32 to vector<8x32xf32>
    %183 = arith.addf %181, %182 : vector<8x32xf32>
    %184 = vector.extract_strided_slice %173 {offsets = [0, 64], sizes = [8, 32], strides = [1, 1]} : vector<8x128xf32> to vector<8x32xf32>
    %185 = vector.extract_strided_slice %173 {offsets = [0, 96], sizes = [8, 32], strides = [1, 1]} : vector<8x128xf32> to vector<8x32xf32>
    %cst_77 = arith.constant 5.000000e-01 : f32
    %186 = vector.broadcast %cst_77 : f32 to vector<8x32xf32>
    %187 = arith.mulf %186, %185 : vector<8x32xf32>
    %cst_78 = arith.constant 5.000000e-01 : f32
    %188 = vector.broadcast %cst_78 : f32 to vector<8x32xf32>
    %189 = arith.addf %187, %188 : vector<8x32xf32>
    %190 = arith.mulf %183, %165 : vector<8x32xf32>
    %191 = arith.mulf %178, %184 : vector<8x32xf32>
    %192 = arith.addf %190, %191 : vector<8x32xf32>
    %193 = math.tanh %192 : vector<8x32xf32>
    %194 = arith.mulf %189, %193 : vector<8x32xf32>
    %195 = arith.truncf %194 : vector<8x32xf32> to vector<8x32xbf16>
    %c40_79 = arith.constant 40 : index
    %c0_80 = arith.constant 0 : index
    %196 = vector.load %arg13[%c40_79, %c0_80] : memref<64x32xbf16, #tpu.memory_space<vmem>>, vector<8x32xbf16>
    tpu.vector_store %arg13[%c40_79, %c0_80], %195 {strides = array<i32>} : memref<64x32xbf16, #tpu.memory_space<vmem>>, vector<8x32xbf16>,
    %c48 = arith.constant 48 : index
    %c0_81 = arith.constant 0 : index
    %197 = vector.load %arg12[%c48, %c0_81] : memref<64x128xf32, #tpu.memory_space<vmem>>, vector<8x128xf32>
    %cst_82 = arith.constant dense<0.000000e+00> : vector<8x128xf32>
    %198 = tpu.matmul %195, %31, %cst_82 {dimension_numbers = #tpu.dot_dimension_numbers<[1], [0], [0], [1], [0, 0, 1, 1], [], []>} : vector<8x32xbf16>, vector<32x128xbf16>, vector<8x128xf32> -> vector<8x128xf32>
    %199 = arith.addf %197, %198 : vector<8x128xf32>
    %200 = math.tanh %199 : vector<8x128xf32>
    %201 = vector.extract_strided_slice %200 {offsets = [0, 0], sizes = [8, 32], strides = [1, 1]} : vector<8x128xf32> to vector<8x32xf32>
    %cst_83 = arith.constant 5.000000e-01 : f32
    %202 = vector.broadcast %cst_83 : f32 to vector<8x32xf32>
    %203 = arith.mulf %202, %201 : vector<8x32xf32>
    %cst_84 = arith.constant 5.000000e-01 : f32
    %204 = vector.broadcast %cst_84 : f32 to vector<8x32xf32>
    %205 = arith.addf %203, %204 : vector<8x32xf32>
    %206 = vector.extract_strided_slice %200 {offsets = [0, 32], sizes = [8, 32], strides = [1, 1]} : vector<8x128xf32> to vector<8x32xf32>
    %cst_85 = arith.constant 5.000000e-01 : f32
    %207 = vector.broadcast %cst_85 : f32 to vector<8x32xf32>
    %208 = arith.mulf %207, %206 : vector<8x32xf32>
    %cst_86 = arith.constant 5.000000e-01 : f32
    %209 = vector.broadcast %cst_86 : f32 to vector<8x32xf32>
    %210 = arith.addf %208, %209 : vector<8x32xf32>
    %211 = vector.extract_strided_slice %200 {offsets = [0, 64], sizes = [8, 32], strides = [1, 1]} : vector<8x128xf32> to vector<8x32xf32>
    %212 = vector.extract_strided_slice %200 {offsets = [0, 96], sizes = [8, 32], strides = [1, 1]} : vector<8x128xf32> to vector<8x32xf32>
    %cst_87 = arith.constant 5.000000e-01 : f32
    %213 = vector.broadcast %cst_87 : f32 to vector<8x32xf32>
    %214 = arith.mulf %213, %212 : vector<8x32xf32>
    %cst_88 = arith.constant 5.000000e-01 : f32
    %215 = vector.broadcast %cst_88 : f32 to vector<8x32xf32>
    %216 = arith.addf %214, %215 : vector<8x32xf32>
    %217 = arith.mulf %210, %192 : vector<8x32xf32>
    %218 = arith.mulf %205, %211 : vector<8x32xf32>
    %219 = arith.addf %217, %218 : vector<8x32xf32>
    %220 = math.tanh %219 : vector<8x32xf32>
    %221 = arith.mulf %216, %220 : vector<8x32xf32>
    %222 = arith.truncf %221 : vector<8x32xf32> to vector<8x32xbf16>
    %c48_89 = arith.constant 48 : index
    %c0_90 = arith.constant 0 : index
    %223 = vector.load %arg13[%c48_89, %c0_90] : memref<64x32xbf16, #tpu.memory_space<vmem>>, vector<8x32xbf16>
    tpu.vector_store %arg13[%c48_89, %c0_90], %222 {strides = array<i32>} : memref<64x32xbf16, #tpu.memory_space<vmem>>, vector<8x32xbf16>,
    %c56 = arith.constant 56 : index
    %c0_91 = arith.constant 0 : index
    %224 = vector.load %arg12[%c56, %c0_91] : memref<64x128xf32, #tpu.memory_space<vmem>>, vector<8x128xf32>
    %cst_92 = arith.constant dense<0.000000e+00> : vector<8x128xf32>
    %225 = tpu.matmul %222, %31, %cst_92 {dimension_numbers = #tpu.dot_dimension_numbers<[1], [0], [0], [1], [0, 0, 1, 1], [], []>} : vector<8x32xbf16>, vector<32x128xbf16>, vector<8x128xf32> -> vector<8x128xf32>
    %226 = arith.addf %224, %225 : vector<8x128xf32>
    %227 = math.tanh %226 : vector<8x128xf32>
    %228 = vector.extract_strided_slice %227 {offsets = [0, 0], sizes = [8, 32], strides = [1, 1]} : vector<8x128xf32> to vector<8x32xf32>
    %cst_93 = arith.constant 5.000000e-01 : f32
    %229 = vector.broadcast %cst_93 : f32 to vector<8x32xf32>
    %230 = arith.mulf %229, %228 : vector<8x32xf32>
    %cst_94 = arith.constant 5.000000e-01 : f32
    %231 = vector.broadcast %cst_94 : f32 to vector<8x32xf32>
    %232 = arith.addf %230, %231 : vector<8x32xf32>
    %233 = vector.extract_strided_slice %227 {offsets = [0, 32], sizes = [8, 32], strides = [1, 1]} : vector<8x128xf32> to vector<8x32xf32>
    %cst_95 = arith.constant 5.000000e-01 : f32
    %234 = vector.broadcast %cst_95 : f32 to vector<8x32xf32>
    %235 = arith.mulf %234, %233 : vector<8x32xf32>
    %cst_96 = arith.constant 5.000000e-01 : f32
    %236 = vector.broadcast %cst_96 : f32 to vector<8x32xf32>
    %237 = arith.addf %235, %236 : vector<8x32xf32>
    %238 = vector.extract_strided_slice %227 {offsets = [0, 64], sizes = [8, 32], strides = [1, 1]} : vector<8x128xf32> to vector<8x32xf32>
    %239 = vector.extract_strided_slice %227 {offsets = [0, 96], sizes = [8, 32], strides = [1, 1]} : vector<8x128xf32> to vector<8x32xf32>
    %cst_97 = arith.constant 5.000000e-01 : f32
    %240 = vector.broadcast %cst_97 : f32 to vector<8x32xf32>
    %241 = arith.mulf %240, %239 : vector<8x32xf32>
    %cst_98 = arith.constant 5.000000e-01 : f32
    %242 = vector.broadcast %cst_98 : f32 to vector<8x32xf32>
    %243 = arith.addf %241, %242 : vector<8x32xf32>
    %244 = arith.mulf %237, %219 : vector<8x32xf32>
    %245 = arith.mulf %232, %238 : vector<8x32xf32>
    %246 = arith.addf %244, %245 : vector<8x32xf32>
    %247 = math.tanh %246 : vector<8x32xf32>
    %248 = arith.mulf %243, %247 : vector<8x32xf32>
    %249 = arith.truncf %248 : vector<8x32xf32> to vector<8x32xbf16>
    %c56_99 = arith.constant 56 : index
    %c0_100 = arith.constant 0 : index
    %250 = vector.load %arg13[%c56_99, %c0_100] : memref<64x32xbf16, #tpu.memory_space<vmem>>, vector<8x32xbf16>
    tpu.vector_store %arg13[%c56_99, %c0_100], %249 {strides = array<i32>} : memref<64x32xbf16, #tpu.memory_space<vmem>>, vector<8x32xbf16>,
    %c0_101 = arith.constant 0 : index
    %c0_102 = arith.constant 0 : index
    %251 = vector.load %arg13[%c0_101, %c0_102] : memref<64x32xbf16, #tpu.memory_space<vmem>>, vector<64x32xbf16>
    %c0_103 = arith.constant 0 : index
    %c0_104 = arith.constant 0 : index
    %252 = vector.load %arg7[%c0_103, %c0_104] : memref<32x128xbf16, #tpu.memory_space<vmem>>, vector<32x128xbf16>
    %cst_105 = arith.constant dense<0.000000e+00> : vector<64x128xf32>
    %253 = tpu.matmul %251, %252, %cst_105 {dimension_numbers = #tpu.dot_dimension_numbers<[1], [0], [0], [1], [0, 0, 1, 1], [], []>} : vector<64x32xbf16>, vector<32x128xbf16>, vector<64x128xf32> -> vector<64x128xf32>
    %c0_106 = arith.constant 0 : index
    %c0_107 = arith.constant 0 : index
    %254 = vector.load %arg8[%c0_106, %c0_107] : memref<1x128xf32, #tpu.memory_space<vmem>>, vector<1x128xf32>
    %255 = vector.broadcast %254 : vector<1x128xf32> to vector<64x128xf32>
    %256 = arith.addf %253, %255 : vector<64x128xf32>
    %c0_108 = arith.constant 0 : index
    %c0_109 = arith.constant 0 : index
    %257 = vector.load %arg9[%c0_108, %c0_109] : memref<64x128xf32, #tpu.memory_space<vmem>>, vector<64x128xf32>
    tpu.vector_store %arg9[%c0_108, %c0_109], %256 {strides = array<i32>} : memref<64x128xf32, #tpu.memory_space<vmem>>, vector<64x128xf32>,
    %c0_110 = arith.constant 0 : index
    %c0_111 = arith.constant 0 : index
    %258 = vector.load %arg10[%c0_110, %c0_111] : memref<8x32xf32, #tpu.memory_space<vmem>>, vector<8x32xf32>
    tpu.vector_store %arg10[%c0_110, %c0_111], %248 {strides = array<i32>} : memref<8x32xf32, #tpu.memory_space<vmem>>, vector<8x32xf32>,
    %c0_112 = arith.constant 0 : index
    %c0_113 = arith.constant 0 : index
    %259 = vector.load %arg11[%c0_112, %c0_113] : memref<8x32xf32, #tpu.memory_space<vmem>>, vector<8x32xf32>
    tpu.vector_store %arg11[%c0_112, %c0_113], %246 {strides = array<i32>} : memref<8x32xf32, #tpu.memory_space<vmem>>, vector<8x32xf32>,
    return
  }
}

</mosaic_0001>

<bundles_post_ra>
// kernel: tpu_custom_call.1
= control target key start
LH: loop header
LB: loop body
LE: loop exit
PB: predicated region body
PF: predicated region fallthrough
CT: control target
= control target key end

     0   :  { %17 = vsyncpa [#allocation5], 0  ;;  %s1645_s0 = inlined_call_operand.vmem [shape: s32[64,1], index: 0, kind: input, shape index: {}]   ;;  %s1646_s1 = inlined_call_operand.hbm [shape: f32[8,32], index: 1, kind: input, shape index: {}]   ;;  %s1647_s2 = inlined_call_operand.hbm [shape: f32[8,32], index: 2, kind: input, shape index: {}]   ;;  %s1648_s3 = inlined_call_operand.vmem [shape: bf16[128,128], index: 3, kind: input, shape index: {}]   ;;  %s1649_s4 = inlined_call_operand.hbm [shape: bf16[128,128], index: 4, kind: input, shape index: {}]   ;;  %s1650_s5 = inlined_call_operand.hbm [shape: bf16[32,128], index: 5, kind: input, shape index: {}]   ;;  %s1651_s6 = inlined_call_operand.vmem [shape: f32[1,128], index: 6, kind: input, shape index: {}]   ;;  %s1652_s7 = inlined_call_operand.hbm [shape: bf16[32,128], index: 7, kind: input, shape index: {}]   ;;  %s1653_s8 = inlined_call_operand.vmem [shape: f32[1,128], index: 8, kind: input, shape index: {}]   ;;  %s1654_s9 = inlined_call_operand.hbm [shape: f32[64,128], index: 9, kind: output, shape index: {0}]   ;;  %s1655_s10 = inlined_call_operand.hbm [shape: f32[8,32], index: 10, kind: output, shape index: {1}]   ;;  %s1656_s11 = inlined_call_operand.hbm [shape: f32[8,32], index: 11, kind: output, shape index: {2}]  }
   0x1   :  { %18 = vsyncpa [#allocation8], 0 }
   0x2   :  { %19 = vsyncpa [#allocation11], 0 }
   0x3   :  { %20 = vsyncpa [#allocation6], 0  ;;  %s40_s19 = sshll.u32 %s1647_s2, 4  ;;  %s41_s19 = int_to_ptr.hbm [resolvable:$true] %s40_s19 }
   0x4   :  { %21 = vsyncpa [#allocation15], 0  ;;  %s1341_s20 = smov [#allocation7]   ;;  %s65_s24 = sshll.u32 %s1650_s5, 4  ;;  %s66_s24 = int_to_ptr.hbm [resolvable:$true] %s65_s24 }
   0x5   :  { %s42_s21 = sshll.u32 %s1341_s20, 4  ;;  %s1342_s25 = smov [#allocation10]   ;;  %s43_s21 = int_to_ptr.vmem [resolvable:$true] %s42_s21 }
   0x6   :  { %45 = dma.hbm_to_vmem [thread:$0]  %s41_s19, 128, %s43_s21, [#allocation8]  }
   0x7   :  { %s67_s26 = sshll.u32 %s1342_s25, 4  ;;  %s29_s29 = sshll.u32 %s1646_s1, 4  ;;  %s68_s26 = int_to_ptr.vmem [resolvable:$true] %s67_s26  ;;  %s30_s29 = int_to_ptr.hbm [resolvable:$true] %s29_s29 }
   0x8   :  { %s1343_s2 = smov 64   ;;  %s1344_s30 = smov 4  }
   0x9   :  { %73 = dma.hbm_to_vmem [thread:$0]  %s66_s24, 256, %s68_s26, [#allocation11], %s1343_s2, %s1343_s2, %s1344_s30  }
   0xa   :  { %s52_s14 = sshll.u32 %s1649_s4, 4  ;;  %s1345_s15 = smov [#allocation4]   ;;  %s53_s14 = int_to_ptr.hbm [resolvable:$true] %s52_s14 }
   0xb   :  { %s31_s5 = sshll.u32 %s1345_s15, 4  ;;  %s1346_s16 = smov [#allocation9]   ;;  %s32_s5 = int_to_ptr.vmem [resolvable:$true] %s31_s5 }
   0xc   :  { %34 = dma.hbm_to_vmem [thread:$0]  %s30_s29, 128, %s32_s5, [#allocation5]  }
   0xd   :  { %s54_s17 = sshll.u32 %s1346_s16, 4  ;;  %s80_s19 = sshll.u32 %s1652_s7, 4  ;;  %s55_s17 = int_to_ptr.vmem [resolvable:$true] %s54_s17  ;;  %s81_s19 = int_to_ptr.hbm [resolvable:$true] %s80_s19 }
   0xe   :  { %60 = dma.hbm_to_vmem [thread:$0]  %s53_s14, 1024, %s55_s17, [#allocation8], %s1343_s2, %s1343_s2, %s1344_s30  }
   0xf   :  { %s1347_s20 = smov [#allocation12]  }
  0x10   :  { %s82_s21 = sshll.u32 %s1347_s20, 4  ;;  %s83_s21 = int_to_ptr.vmem [resolvable:$true] %s82_s21 }
  0x11   :  { %88 = dma.hbm_to_vmem [thread:$0]  %s81_s19, 256, %s83_s21, [#allocation11], %s1343_s2, %s1343_s2, %s1344_s30  }
  0x12   :  { %1331 = dma.done.wait [#allocation5], 128  }
  0x13   :  { %1332 = vsyncadd [#allocation5], 4294967168 }
  0x14   :  { %1333 = dma.done.wait [#allocation8], 1152  }
  0x15   :  { %1334 = vsyncadd [#allocation8], 4294966144 }
  0x16   :  { %1335 = dma.done.wait [#allocation11], 512  }
  0x17   :  { %1336 = vsyncadd [#allocation11], 4294966784  ;;  %v1348_v0 = vmov 0   ;;  %v114_v1 = vld [vmem:[%s1645_s0] sm:$0xff]  ;;  %v1059_v2 = vld [vmem:[%s1648_s3 + $0x38] sm:$0xff]  ;;  %v112_v11 = vlaneseq  ;;  %v1349_v16 = vmov 0.5  }
  0x18   :  { %1102 = vset.pattern.permute.xlu0 %v1348_v0  ;;  %1103 = vset.pattern.permute.xlu1 %v1348_v0  ;;  %v1058_v3 = vld [vmem:[%s1648_s3 + $0x30] sm:$0xff]  ;;  %v115_v4 = vld [vmem:[%s1645_s0 + $0x8] sm:$0xff]  ;;  %v1056_v6 = vld [vmem:[%s1648_s3 + $0x20] sm:$0xff]  ;;  %v1350_v34 = vmov 1.0|1.0   ;;  %vm400_vm6 = vcmask 261120  }
  0x19   :  { %1104 = vset.pattern.permute.xlu2 %v1348_v0  ;;  %123 = vperm.xlu0 %1102, %v114_v1   ;;  %v1057_v5 = vld [vmem:[%s1648_s3 + $0x28] sm:$0xff]  ;;  %v1055_v7 = vld [vmem:[%s1648_s3 + $0x18] sm:$0xff]  ;;  %v1054_v8 = vld [vmem:[%s1648_s3 + $0x10] sm:$0xff]  ;;  %v1469_v12 = vand.u32 127, %v112_v11  ;;  %s1351_s20 = smov 32   ;;  %s1353_s12 = smov [#allocation14]  }
  0x1a   :  { %230 = vmatpush.bf16.msra.mxu0 %v1059_v2  ;;  %v1053_v9 = vld [vmem:[%s1648_s3 + $0x8] sm:$0xff]  ;;  %v1052_v10 = vld [vmem:[%s1648_s3] sm:$0xff]  ;;  %v1082_v14 = vld [vmem:[#allocation10 + $0x8] sm:$0xff]   ;;  %s912_s15 = sshll.u32 %s1655_s10, 4  ;;  %s1354_s5 = smov [#allocation16]   ;;  %s913_s15 = int_to_ptr.hbm [resolvable:$true] %s912_s15 }
  0x1b   :  { %v1067_v13 = vld [vmem:[#allocation9 + $0x38] sm:$0xff]  ;;  %vm360_vm0 = vcmp.ge.s32.totalorder %v1469_v12, 64  ;;  %vm361_vm1 = vcmp.lt.s32.totalorder %v1469_v12, 96  ;;  %v1066_v15 = vld [vmem:[#allocation9 + $0x30] sm:$0xff]  ;;  %v1080_v18 = vunpack.c.l.bf16 %v1082_v14  ;;  %v1081_v19 = vunpack.c.h.bf16 %v1082_v14  ;;  %v1075_v20 = vld [vmem:[#allocation10] sm:$0xff]   ;;  %s921_s16 = sshll.u32 %s1354_s5, 4  ;;  %s922_s16 = int_to_ptr.vmem [resolvable:$true] %s921_s16 }
  0x1c   :  { %vm362_vm2 = vmand %vm360_vm0, %vm361_vm1  ;;  %331 = vmatpush.bf16.msra.mxu1 %v1067_v13  ;;  %v1076_v21 = vunpack.c.l.bf16 %v1075_v20  ;;  %v1077_v22 = vunpack.c.h.bf16 %v1075_v20  ;;  %v1065_v27 = vld [vmem:[#allocation9 + $0x28] sm:$0xff]  ;;  %v1064_v30 = vld [vmem:[#allocation9 + $0x20] sm:$0xff]  ;;  %vm447_vm0 = vcmask 257024   ;;  %s923_s1 = sshll.u32 %s1656_s11, 4  ;;  %s1355_s10 = smov [#allocation13]   ;;  %s924_s1 = int_to_ptr.hbm [resolvable:$true] %s923_s1 }
  0x1d   :  { %v1473_v17 = vsel %vm362_vm2, 1.0, %v1349_v16  ;;  %v1063_v31 = vld [vmem:[#allocation9 + $0x18] sm:$0xff]  ;;  %v1062_v35 = vld [vmem:[#allocation9 + $0x10] sm:$0xff]  ;;  %v1061_v38 = vld [vmem:[#allocation9 + $0x8] sm:$0xff]  ;;  %s896_s11 = sshll.u32 %s1355_s10, 4  ;;  %s1357_s21 = smov 8   ;;  %s897_s11 = int_to_ptr.vmem [resolvable:$true] %s896_s11 }
  0x1e   :  { %231 = vmatpush.bf16.msra.mxu0 %v1058_v3  ;;  %v392_v23 = vmul.f32 %v1080_v18, %v1473_v17  ;;  %v393_v24 = vmul.f32 %v1081_v19, %v1473_v17  ;;  %v390_v25 = vmul.f32 %v1076_v21, %v1473_v17  ;;  %v391_v26 = vmul.f32 %v1077_v22, %v1473_v17  ;;  %v396_v36 = vld [vmem:[#allocation4] sm:$0xff]  ;;  %v1060_v39 = vld [vmem:[#allocation9] sm:$0xff]  ;;  %v397_v51 = vld [vmem:[#allocation7] sm:$0xff] }
  0x1f   :  { %v398_v37 = vpack.c.bf16 %v396_v36, %v396_v36  ;;  %v1500_v45 = vld [vmem:[%s1651_s6] ss:$0 sm:$0xff]  ;;  %v116_v3 = vld [vmem:[%s1645_s0 + $0x10] sm:$0xff]  ;;  %v117_v11 = vld [vmem:[%s1645_s0 + $0x18] sm:$0xff]  ;;  %s1356_s6 = smov 128  }
  0x20   :  { %332 = vmatpush.bf16.msra.mxu1 %v1066_v15  ;;  %v1479_v28 = vpack.c.bf16 %v393_v24, %v392_v23  ;;  %v1482_v29 = vpack.c.bf16 %v391_v26, %v390_v25 }
  0x21   :  { %126 = vperm.xlu0 %1102, %v115_v4  }
  0x22   :  { %232 = vmatpush.bf16.msra.mxu0 %v1057_v5  ;;  %410 = vmatpush.bf16.msra.mxu2 %v1479_v28 }
  0x23   :  { %463 = vmatpush.bf16.msra.mxu3 %v1479_v28 }
  0x24   :  { %333 = vmatpush.bf16.msra.mxu1 %v1065_v27 }
  0x26   :  { %233 = vmatpush.bf16.msra.mxu0 %v1056_v6  ;;  %411 = vmatpush.bf16.msra.mxu2 %v1482_v29 }
  0x27   :  { %464 = vmatpush.bf16.msra.mxu3 %v1482_v29 }
  0x28   :  { %334 = vmatpush.bf16.msra.mxu1 %v1064_v30 }
  0x29   :  { %1016 = vmatmul.msk.bf16.vlgmr.msra.gmra.mxu2 %vm400_vm6, %v398_v37 }
  0x2a   :  { %234 = vmatpush.bf16.msra.mxu0 %v1055_v7  ;;  %511 = vmatpush.bf16.msrb.mxu2 %v1479_v28 }
  0x2b   :  { %559 = vmatpush.bf16.msrb.mxu3 %v1479_v28 }
  0x2c   :  { %335 = vmatpush.bf16.msra.mxu1 %v1063_v31 }
  0x2e   :  { %235 = vmatpush.bf16.msra.mxu0 %v1054_v8  ;;  %512 = vmatpush.bf16.msrb.mxu2 %v1482_v29 }
  0x2f   :  { %560 = vmatpush.bf16.msrb.mxu3 %v1482_v29 }
  0x30   :  { %336 = vmatpush.bf16.msra.mxu1 %v1062_v35 }
  0x32   :  { %236 = vmatpush.bf16.msra.mxu0 %v1053_v9  ;;  %607 = vmatpush.bf16.msra.mxu2 %v1479_v28 }
  0x34   :  { %337 = vmatpush.bf16.msra.mxu1 %v1061_v38 }
  0x36   :  { %237 = vmatpush.bf16.msra.mxu0 %v1052_v10  ;;  %608 = vmatpush.bf16.msra.mxu2 %v1482_v29 }
  0x38   :  { %338 = vmatpush.bf16.msra.mxu1 %v1060_v39 }
  0x8b   :  { %v124_v32 = vpop.permute.xlu0 %123 }
  0x8c   :  { %vm146_vm3 = vcmp.eq.s32.totalorder %v124_v32, %v1469_v12 }
  0x93   :  { %v127_v33 = vpop.permute.xlu0 %126 }
  0x94   :  { %vm147_vm4 = vcmp.eq.s32.totalorder %v127_v33, %v1469_v12 }
  0x95   :  { %vm976_vm5 = vmpackc.low %vm147_vm4, %vm146_vm3 }
  0x96   :  { %977 = vmatmul.msk.bf16.vlgmr.msra.gmra.mxu0 %vm976_vm5, %v1350_v34 }
  0xac   :  { %v413_v43 = vpop.f32.mrf.mxu2 }
  0xb4   :  { %v415_v44 = vpop.f32.mrf.mxu2 }
 0x113   :  { %v239_v40 = vpop.f32.mrf.mxu0 }
 0x11b   :  { %v241_v41 = vpop.f32.mrf.mxu0 }
 0x11c   :  { %v259_v42 = vpack.c.bf16 %v241_v41, %v239_v40 }
 0x11e   :  { %339 = vmatmul.bf16.vlgmr.msra.gmra.mxu1 %v259_v42 }
 0x19b   :  { %v340_v46 = vpop.f32.mrf.mxu1 }
 0x19c   :  { %v341_v47 = vadd.f32 %v1500_v45, %v340_v46 }
 0x19e   :  { %v364_v48 = vmul.f32 %v1473_v17, %v341_v47 }
 0x1a0   :  { %v417_v49 = vadd.f32 %v413_v43, %v364_v48  ;;  %v118_v48 = vld [vmem:[%s1645_s0 + $0x20] sm:$0xff] }
 0x1a2   :  { %1107 = vtanh.f32 %v417_v49 }
 0x1a3   :  { %v342_v4 = vpop.f32.mrf.mxu1 }
 0x1a4   :  { %v343_v5 = vadd.f32 %v1500_v45, %v342_v4 }
 0x1a6   :  { %v365_v6 = vmul.f32 %v1473_v17, %v343_v5 }
 0x1a8   :  { %v1108_v50 = vpop.eup %1107 }
 0x1a9   :  { %427 = vrot.lane.b32.xlu1 %v1108_v50, %s1343_s2  ;;  %v419_v52 = vmul.f32 0.5, %v1108_v50 }
 0x1ab   :  { %v420_v53 = vadd.f32 0.5, %v419_v52 }
 0x1b1   :  { %422 = vrot.lane.b32.xlu1 %v397_v51, %s1351_s20 }
 0x1b9   :  { %129 = vperm.xlu1 %1103, %v116_v3  }
 0x21b   :  { %v428_v54 = vpop.permute.xlu1 %427 }
 0x21c   :  { %v430_v55 = vmul.f32 %v428_v54, %v420_v53 }
 0x21e   :  { %432 = vrot.lane.b32.xlu2 %v430_v55, %s1351_s20 }
 0x223   :  { %v423_v56 = vpop.permute.xlu1 %422 }
 0x224   :  { %v425_v57 = vmul.f32 %v423_v56, %v420_v53 }
 0x22b   :  { %v130_v18 = vpop.permute.xlu1 %129 }
 0x22c   :  { %vm148_vm7 = vcmp.eq.s32.totalorder %v130_v18, %v1469_v12 }
 0x278   :  { %v433_v58 = vpop.permute.xlu2 %432 }
 0x279   :  { %v435_v59 = vadd.f32 %v433_v58, %v425_v57 }
 0x27b   :  { %1109 = vtanh.f32 %v435_v59 }
 0x281   :  { %v1110_v60 = vpop.eup %1109 }
 0x282   :  { %438 = vrot.lane.b32.xlu2 %v1110_v60, %s1343_s2 }
 0x28a   :  { %132 = vperm.xlu2 %1104, %v117_v11  }
 0x2dc   :  { %v439_v61 = vpop.permute.xlu2 %438 }
 0x2dd   :  { %v441_v62 = vmul.f32 %v439_v61, %v420_v53  ;;  %v119_v53 = vld [vmem:[%s1645_s0 + $0x28] sm:$0xff] }
 0x2df   :  { %v1508_v63 = vpack.c.bf16 %v441_v62, %v441_v62 }
 0x2e1   :  { %v450_v0 = vunpack.c.l.b16 %v1508_v63 }
 0x2e3   :  { %v451_v1 = vpack.c.b16 %v450_v0, %v450_v0 }
 0x2e4   :  { %v133_v19 = vpop.permute.xlu2 %132 }
 0x2e5   :  { %452 = vrot.lane.b32.xlu0 %v451_v1, %s1351_s20  ;;  %vm149_vm8 = vcmp.eq.s32.totalorder %v133_v19, %v1469_v12 }
 0x2e6   :  { %vm978_vm9 = vmpackc.low %vm149_vm8, %vm148_vm7 }
 0x2e7   :  { %979 = vmatmul.msk.bf16.gmra.mxu0 %vm978_vm9, %v1350_v34 }
 0x357   :  { %v453_v2 = vpop.permute.xlu0 %452 }
 0x358   :  { %1017 = vmatmul.msk.bf16.vlgmr.msra.gmra.mxu3 %vm400_vm6, %v453_v2 }
 0x359   :  { %655 = vmatpush.bf16.msra.mxu3 %v1479_v28 }
 0x35d   :  { %656 = vmatpush.bf16.msra.mxu3 %v1482_v29 }
 0x364   :  { %v244_v24 = vpop.f32.mrf.mxu0 }
 0x36c   :  { %v246_v25 = vpop.f32.mrf.mxu0 }
 0x36d   :  { %v260_v26 = vpack.c.bf16 %v246_v25, %v244_v24 }
 0x36f   :  { %344 = vmatmul.bf16.gmra.mxu1 %v260_v26 }
 0x3db   :  { %v466_v7 = vpop.f32.mrf.mxu3 }
 0x3dc   :  { %v470_v8 = vadd.f32 %v466_v7, %v365_v6 }
 0x3de   :  { %1111 = vtanh.f32 %v470_v8 }
 0x3e3   :  { %v468_v9 = vpop.f32.mrf.mxu3 }
 0x3e4   :  { %v1112_v10 = vpop.eup %1111 }
 0x3e5   :  { %476 = vrot.lane.b32.xlu0 %v1112_v10, %s1343_s2  ;;  %v472_v13 = vmul.f32 0.5, %v1112_v10 }
 0x3e7   :  { %v473_v14 = vadd.f32 0.5, %v472_v13 }
 0x3e9   :  { %v474_v20 = vmul.f32 %v473_v14, %v435_v59 }
 0x3ec   :  { %v345_v36 = vpop.f32.mrf.mxu1 }
 0x3ed   :  { %v346_v37 = vadd.f32 %v1500_v45, %v345_v36 }
 0x3ef   :  { %v366_v38 = vmul.f32 %v1473_v17, %v346_v37 }
 0x3f4   :  { %v347_v2 = vpop.f32.mrf.mxu1 }
 0x3f5   :  { %v348_v3 = vadd.f32 %v1500_v45, %v347_v2 }
 0x3f7   :  { %v367_v4 = vmul.f32 %v1473_v17, %v348_v3 }
 0x457   :  { %v477_v15 = vpop.permute.xlu0 %476 }
 0x458   :  { %v479_v16 = vmul.f32 %v477_v15, %v473_v14 }
 0x45a   :  { %481 = vrot.lane.b32.xlu1 %v479_v16, %s1351_s20 }
 0x4cc   :  { %v482_v21 = vpop.permute.xlu1 %481 }
 0x4cd   :  { %v484_v22 = vadd.f32 %v482_v21, %v474_v20 }
 0x4cf   :  { %1113 = vtanh.f32 %v484_v22 }
 0x4d5   :  { %v1114_v23 = vpop.eup %1113 }
 0x4d6   :  { %487 = vrot.lane.b32.xlu2 %v1114_v23, %s1343_s2 }
 0x530   :  { %v488_v27 = vpop.permute.xlu2 %487 }
 0x531   :  { %v490_v30 = vmul.f32 %v488_v27, %v473_v14 }
 0x533   :  { %v1529_v31 = vpack.c.bf16 %v490_v30, %v490_v30 }
 0x535   :  { %v498_v32 = vunpack.c.l.b16 %v1529_v31 }
 0x537   :  { %v499_v33 = vpack.c.b16 %v498_v32, %v498_v32 }
 0x539   :  { %500 = vrot.lane.b32.xlu0 %v499_v33, %s1351_s20 }
 0x5ab   :  { %v501_v35 = vpop.permute.xlu0 %500 }
 0x5ac   :  { %1018 = vmatmul.msk.bf16.vlgmr.msrb.gmra.mxu2 %vm400_vm6, %v501_v35 }
 0x5ad   :  { %703 = vmatpush.bf16.msrb.mxu2 %v1479_v28 }
 0x5b1   :  { %704 = vmatpush.bf16.msrb.mxu2 %v1482_v29 }
 0x62f   :  { %v514_v39 = vpop.f32.mrf.mxu2 }
 0x630   :  { %v518_v40 = vadd.f32 %v514_v39, %v366_v38  ;;  %v120_v38 = vld [vmem:[%s1645_s0 + $0x30] sm:$0xff] }
 0x632   :  { %1115 = vtanh.f32 %v518_v40 }
 0x637   :  { %v516_v41 = vpop.f32.mrf.mxu2 }
 0x638   :  { %v1116_v42 = vpop.eup %1115 }
 0x639   :  { %524 = vrot.lane.b32.xlu1 %v1116_v42, %s1343_s2  ;;  %v520_v43 = vmul.f32 0.5, %v1116_v42 }
 0x63b   :  { %v521_v44 = vadd.f32 0.5, %v520_v43  ;;  %v121_v43 = vld [vmem:[%s1645_s0 + $0x38] sm:$0xff]  ;;  %s1352_s0 = smov 96  }
 0x63d   :  { %v522_v49 = vmul.f32 %v521_v44, %v484_v22 }
 0x6ab   :  { %v525_v46 = vpop.permute.xlu1 %524 }
 0x6ac   :  { %v527_v47 = vmul.f32 %v525_v46, %v521_v44 }
 0x6ae   :  { %529 = vrot.lane.b32.xlu2 %v527_v47, %s1351_s20 }
 0x6b6   :  { %135 = vperm.xlu2 %1104, %v118_v48  }
 0x708   :  { %v530_v50 = vpop.permute.xlu2 %529 }
 0x709   :  { %v532_v51 = vadd.f32 %v530_v50, %v522_v49 }
 0x70b   :  { %1117 = vtanh.f32 %v532_v51 }
 0x710   :  { %v136_v58 = vpop.permute.xlu2 %135 }
 0x711   :  { %v1118_v52 = vpop.eup %1117  ;;  %vm150_vm10 = vcmp.eq.s32.totalorder %v136_v58, %v1469_v12 }
 0x712   :  { %535 = vrot.lane.b32.xlu0 %v1118_v52, %s1343_s2 }
 0x71a   :  { %138 = vperm.xlu0 %1102, %v119_v53  }
 0x784   :  { %v536_v54 = vpop.permute.xlu0 %535 }
 0x785   :  { %v538_v55 = vmul.f32 %v536_v54, %v521_v44 }
 0x787   :  { %v1547_v56 = vpack.c.bf16 %v538_v55, %v538_v55 }
 0x789   :  { %v546_v57 = vunpack.c.l.b16 %v1547_v56 }
 0x78b   :  { %v547_v59 = vpack.c.b16 %v546_v57, %v546_v57 }
 0x78c   :  { %v139_v60 = vpop.permute.xlu0 %138 }
 0x78d   :  { %vm151_vm11 = vcmp.eq.s32.totalorder %v139_v60, %v1469_v12  ;;  %548 = vrot.lane.b32.xlu1 %v547_v59, %s1351_s20 }
 0x78e   :  { %vm980_vm12 = vmpackc.low %vm151_vm11, %vm150_vm10 }
 0x78f   :  { %981 = vmatmul.msk.bf16.gmra.mxu0 %vm980_vm12, %v1350_v34 }
 0x7ff   :  { %v549_v61 = vpop.permute.xlu1 %548 }
 0x800   :  { %1019 = vmatmul.msk.bf16.vlgmr.msrb.gmra.mxu3 %vm400_vm6, %v549_v61 }
 0x801   :  { %751 = vmatpush.bf16.msrb.mxu3 %v1479_v28 }
 0x805   :  { %752 = vmatpush.bf16.msrb.mxu3 %v1482_v29 }
 0x80c   :  { %v249_v62 = vpop.f32.mrf.mxu0 }
 0x814   :  { %v251_v0 = vpop.f32.mrf.mxu0 }
 0x815   :  { %v261_v1 = vpack.c.bf16 %v251_v0, %v249_v62 }
 0x817   :  { %349 = vmatmul.bf16.gmra.mxu1 %v261_v1 }
 0x883   :  { %v562_v5 = vpop.f32.mrf.mxu3 }
 0x884   :  { %v566_v6 = vadd.f32 %v562_v5, %v367_v4 }
 0x886   :  { %1119 = vtanh.f32 %v566_v6 }
 0x88b   :  { %v564_v7 = vpop.f32.mrf.mxu3 }
 0x88c   :  { %v1120_v8 = vpop.eup %1119 }
 0x88d   :  { %572 = vrot.lane.b32.xlu1 %v1120_v8, %s1343_s2  ;;  %v568_v9 = vmul.f32 0.5, %v1120_v8 }
 0x88f   :  { %v569_v28 = vadd.f32 0.5, %v568_v9 }
 0x891   :  { %v570_v11 = vmul.f32 %v569_v28, %v532_v51 }
 0x894   :  { %v350_v23 = vpop.f32.mrf.mxu1 }
 0x895   :  { %v351_v24 = vadd.f32 %v1500_v45, %v350_v23 }
 0x897   :  { %v368_v25 = vmul.f32 %v1473_v17, %v351_v24 }
 0x89c   :  { %v352_v57 = vpop.f32.mrf.mxu1 }
 0x89d   :  { %v353_v58 = vadd.f32 %v1500_v45, %v352_v57 }
 0x89f   :  { %v369_v59 = vmul.f32 %v1473_v17, %v353_v58 }
 0x8ff   :  { %v573_v10 = vpop.permute.xlu1 %572 }
 0x900   :  { %v575_v29 = vmul.f32 %v573_v10, %v569_v28 }
 0x902   :  { %577 = vrot.lane.b32.xlu2 %v575_v29, %s1351_s20 }
 0x95c   :  { %v578_v13 = vpop.permute.xlu2 %577 }
 0x95d   :  { %v580_v14 = vadd.f32 %v578_v13, %v570_v11 }
 0x95f   :  { %1121 = vtanh.f32 %v580_v14 }
 0x965   :  { %v1122_v15 = vpop.eup %1121 }
 0x966   :  { %583 = vrot.lane.b32.xlu0 %v1122_v15, %s1343_s2 }
 0x9d8   :  { %v584_v16 = vpop.permute.xlu0 %583 }
 0x9d9   :  { %v586_v18 = vmul.f32 %v584_v16, %v569_v28 }
 0x9db   :  { %v1562_v19 = vpack.c.bf16 %v586_v18, %v586_v18 }
 0x9dd   :  { %v594_v20 = vunpack.c.l.b16 %v1562_v19 }
 0x9df   :  { %v595_v21 = vpack.c.b16 %v594_v20, %v594_v20 }
 0x9e1   :  { %596 = vrot.lane.b32.xlu1 %v595_v21, %s1351_s20 }
 0xa53   :  { %v597_v22 = vpop.permute.xlu1 %596 }
 0xa54   :  { %1020 = vmatmul.msk.bf16.vlgmr.msra.gmra.mxu2 %vm400_vm6, %v597_v22 }
 0xad7   :  { %v610_v26 = vpop.f32.mrf.mxu2 }
 0xad8   :  { %v614_v27 = vadd.f32 %v610_v26, %v368_v25 }
 0xada   :  { %1123 = vtanh.f32 %v614_v27 }
 0xadf   :  { %v612_v30 = vpop.f32.mrf.mxu2 }
 0xae0   :  { %v1124_v32 = vpop.eup %1123 }
 0xae1   :  { %620 = vrot.lane.b32.xlu2 %v1124_v32, %s1343_s2  ;;  %v616_v33 = vmul.f32 0.5, %v1124_v32 }
 0xae3   :  { %v617_v35 = vadd.f32 0.5, %v616_v33 }
 0xae5   :  { %v618_v39 = vmul.f32 %v617_v35, %v580_v14 }
 0xb3b   :  { %v621_v36 = vpop.permute.xlu2 %620 }
 0xb3c   :  { %v623_v37 = vmul.f32 %v621_v36, %v617_v35 }
 0xb3e   :  { %625 = vrot.lane.b32.xlu0 %v623_v37, %s1351_s20 }
 0xb46   :  { %141 = vperm.xlu0 %1102, %v120_v38  }
 0xbb0   :  { %v626_v40 = vpop.permute.xlu0 %625 }
 0xbb1   :  { %v628_v41 = vadd.f32 %v626_v40, %v618_v39 }
 0xbb3   :  { %1125 = vtanh.f32 %v628_v41 }
 0xbb8   :  { %v142_v49 = vpop.permute.xlu0 %141 }
 0xbb9   :  { %v1126_v42 = vpop.eup %1125  ;;  %vm152_vm13 = vcmp.eq.s32.totalorder %v142_v49, %v1469_v12 }
 0xbba   :  { %631 = vrot.lane.b32.xlu1 %v1126_v42, %s1343_s2 }
 0xbc2   :  { %144 = vperm.xlu1 %1103, %v121_v43  }
 0xc2c   :  { %v632_v44 = vpop.permute.xlu1 %631 }
 0xc2d   :  { %v634_v46 = vmul.f32 %v632_v44, %v617_v35 }
 0xc2f   :  { %v1578_v47 = vpack.c.bf16 %v634_v46, %v634_v46 }
 0xc31   :  { %v642_v48 = vunpack.c.l.b16 %v1578_v47 }
 0xc33   :  { %v643_v50 = vpack.c.b16 %v642_v48, %v642_v48 }
 0xc34   :  { %v145_v51 = vpop.permute.xlu1 %144 }
 0xc35   :  { %vm153_vm14 = vcmp.eq.s32.totalorder %v145_v51, %v1469_v12  ;;  %644 = vrot.lane.b32.xlu2 %v643_v50, %s1351_s20 }
 0xc36   :  { %vm982_vm15 = vmpackc.low %vm153_vm14, %vm152_vm13 }
 0xc37   :  { %983 = vmatmul.msk.bf16.gmra.mxu0 %vm982_vm15, %v1350_v34 }
 0xc8f   :  { %v645_v52 = vpop.permute.xlu2 %644 }
 0xc90   :  { %1021 = vmatmul.msk.bf16.vlgmr.msra.gmra.mxu3 %vm400_vm6, %v645_v52  ;;  %v1073_v52 = vld [vmem:[#allocation12 + $0x8] sm:$0xff] }
 0xc91   :  { %851 = vmatpush.bf16.msra.mxu2 %v1073_v52  ;;  %1083 = vmatpush.bf16.msra.mxu3 %v1073_v52 }
 0xcb4   :  { %v254_v53 = vpop.f32.mrf.mxu0 }
 0xcbc   :  { %v256_v54 = vpop.f32.mrf.mxu0 }
 0xcbd   :  { %v262_v55 = vpack.c.bf16 %v256_v54, %v254_v53  ;;  %v1072_v53 = vld [vmem:[#allocation12] sm:$0xff] }
 0xcbe   :  { %852 = vmatpush.bf16.msra.mxu2 %v1072_v53  ;;  %1084 = vmatpush.bf16.msra.mxu3 %v1072_v53 }
 0xcbf   :  { %354 = vmatmul.bf16.gmra.mxu1 %v262_v55 }
 0xd13   :  { %v658_v60 = vpop.f32.mrf.mxu3 }
 0xd14   :  { %v662_v61 = vadd.f32 %v658_v60, %v369_v59 }
 0xd16   :  { %1127 = vtanh.f32 %v662_v61 }
 0xd1b   :  { %v660_v12 = vpop.f32.mrf.mxu3 }
 0xd1c   :  { %v1128_v62 = vpop.eup %1127 }
 0xd1d   :  { %668 = vrot.lane.b32.xlu2 %v1128_v62, %s1343_s2  ;;  %v664_v34 = vmul.f32 0.5, %v1128_v62 }
 0xd1f   :  { %v665_v0 = vadd.f32 0.5, %v664_v34 }
 0xd21   :  { %v666_v3 = vmul.f32 %v665_v0, %v628_v41 }
 0xd3c   :  { %v355_v11 = vpop.f32.mrf.mxu1 }
 0xd3d   :  { %v356_v13 = vadd.f32 %v1500_v45, %v355_v11 }
 0xd3f   :  { %v370_v14 = vmul.f32 %v1473_v17, %v356_v13 }
 0xd44   :  { %v357_v39 = vpop.f32.mrf.mxu1 }
 0xd45   :  { %v358_v40 = vadd.f32 %v1500_v45, %v357_v39 }
 0xd47   :  { %v371_v41 = vmul.f32 %v1473_v17, %v358_v40 }
 0xd77   :  { %v669_v1 = vpop.permute.xlu2 %668 }
 0xd78   :  { %v671_v2 = vmul.f32 %v669_v1, %v665_v0 }
 0xd7a   :  { %673 = vrot.lane.b32.xlu0 %v671_v2, %s1351_s20 }
 0xdec   :  { %v674_v4 = vpop.permute.xlu0 %673 }
 0xded   :  { %v676_v5 = vadd.f32 %v674_v4, %v666_v3 }
 0xdef   :  { %1129 = vtanh.f32 %v676_v5 }
 0xdf5   :  { %v1130_v6 = vpop.eup %1129 }
 0xdf6   :  { %679 = vrot.lane.b32.xlu1 %v1130_v6, %s1343_s2 }
 0xe68   :  { %v680_v7 = vpop.permute.xlu1 %679 }
 0xe69   :  { %v682_v8 = vmul.f32 %v680_v7, %v665_v0 }
 0xe6b   :  { %v683_v9 = vpack.c.bf16 %v682_v8, %v682_v8 }
 0xe6d   :  { %v690_v28 = vunpack.c.l.b16 %v683_v9 }
 0xe6f   :  { %v691_v10 = vpack.c.b16 %v690_v28, %v690_v28 }
 0xe71   :  { %692 = vrot.lane.b32.xlu2 %v691_v10, %s1351_s20 }
 0xecb   :  { %v693_v29 = vpop.permute.xlu2 %692 }
 0xecc   :  { %1022 = vmatmul.msk.bf16.vlgmr.msrb.gmra.mxu2 %vm400_vm6, %v693_v29 }
 0xf4f   :  { %v706_v15 = vpop.f32.mrf.mxu2 }
 0xf50   :  { %v710_v16 = vadd.f32 %v706_v15, %v370_v14 }
 0xf52   :  { %1131 = vtanh.f32 %v710_v16 }
 0xf57   :  { %v708_v18 = vpop.f32.mrf.mxu2 }
 0xf58   :  { %v1132_v20 = vpop.eup %1131 }
 0xf59   :  { %716 = vrot.lane.b32.xlu0 %v1132_v20, %s1343_s2  ;;  %v712_v21 = vmul.f32 0.5, %v1132_v20 }
 0xf5b   :  { %v713_v22 = vadd.f32 0.5, %v712_v21 }
 0xf5d   :  { %v714_v25 = vmul.f32 %v713_v22, %v676_v5 }
 0xfcb   :  { %v717_v23 = vpop.permute.xlu0 %716 }
 0xfcc   :  { %v719_v24 = vmul.f32 %v717_v23, %v713_v22 }
 0xfce   :  { %721 = vrot.lane.b32.xlu1 %v719_v24, %s1351_s20 }
0x1040   :  { %v722_v26 = vpop.permute.xlu1 %721 }
0x1041   :  { %v724_v27 = vadd.f32 %v722_v26, %v714_v25 }
0x1043   :  { %1133 = vtanh.f32 %v724_v27 }
0x1049   :  { %v1134_v30 = vpop.eup %1133 }
0x104a   :  { %727 = vrot.lane.b32.xlu2 %v1134_v30, %s1343_s2 }
0x10a4   :  { %v728_v32 = vpop.permute.xlu2 %727 }
0x10a5   :  { %v730_v33 = vmul.f32 %v728_v32, %v713_v22 }
0x10a7   :  { %v731_v35 = vpack.c.bf16 %v730_v33, %v730_v33 }
0x10a9   :  { %v738_v36 = vunpack.c.l.b16 %v731_v35 }
0x10ab   :  { %v739_v37 = vpack.c.b16 %v738_v36, %v738_v36 }
0x10ad   :  { %740 = vrot.lane.b32.xlu0 %v739_v37, %s1351_s20 }
0x111f   :  { %v741_v38 = vpop.permute.xlu0 %740 }
0x1120   :  { %1023 = vmatmul.msk.bf16.vlgmr.msrb.gmra.mxu3 %vm400_vm6, %v741_v38 }
0x11a3   :  { %v754_v42 = vpop.f32.mrf.mxu3 }
0x11a4   :  { %v758_v43 = vadd.f32 %v754_v42, %v371_v41 }
0x11a6   :  { %1135 = vtanh.f32 %v758_v43 }
0x11ab   :  { %v756_v44 = vpop.f32.mrf.mxu3 }
0x11ac   :  { %v1136_v46 = vpop.eup %1135 }
0x11ad   :  { %764 = vrot.lane.b32.xlu1 %v1136_v46, %s1343_s2  ;;  %v760_v48 = vmul.f32 0.5, %v1136_v46 }
0x11af   :  { %v761_v49 = vadd.f32 0.5, %v760_v48 }
0x11b1   :  { %v762_v54 = vmul.f32 %v761_v49, %v724_v27 }
0x11b5   :  { %444 = vrot.lane.b32.xlu1 %v1508_v63, %s1351_s20 }
0x11bd   :  { %685 = vrot.lane.b32.xlu1 %v683_v9, %s1351_s20 }
0x11c5   :  { %733 = vrot.lane.b32.xlu1 %v731_v35, %s1351_s20 }
0x121f   :  { %v765_v50 = vpop.permute.xlu1 %764 }
0x1220   :  { %v767_v45 = vmul.f32 %v765_v50, %v761_v49 }
0x1222   :  { %769 = vrot.lane.b32.xlu2 %v767_v45, %s1351_s20 }
0x1227   :  { %v445_v17 = vpop.permute.xlu1 %444 }
0x1228   :  { %448 = vst.msk [vmem:[#allocation3] sm:$0xf] %vm447_vm0, %v445_v17 }
0x122a   :  { %493 = vrot.lane.b32.xlu2 %v1529_v31, %s1351_s20 }
0x122f   :  { %v686_v51 = vpop.permute.xlu1 %685 }
0x1230   :  { %688 = vst.msk [vmem:[#allocation3 + $0x14] sm:$0xf] %vm447_vm0, %v686_v51 }
0x1232   :  { %541 = vrot.lane.b32.xlu2 %v1547_v56, %s1351_s20 }
0x1237   :  { %v734_v63 = vpop.permute.xlu1 %733 }
0x1238   :  { %736 = vst.msk [vmem:[#allocation3 + $0x18] sm:$0xf] %vm447_vm0, %v734_v63 }
0x127c   :  { %v770_v55 = vpop.permute.xlu2 %769 }
0x127d   :  { %v772_v57 = vadd.f32 %v770_v55, %v762_v54 }
0x127f   :  { %1137 = vtanh.f32 %v772_v57  ;;  %888 = vrot.lane.b32.xlu1 %v772_v57, %s1352_s0 }
0x1284   :  { %v494_v31 = vpop.permute.xlu2 %493 }
0x1285   :  { %v1138_v58 = vpop.eup %1137  ;;  %496 = vst.msk [vmem:[#allocation3 + $0x4] sm:$0xf] %vm447_vm0, %v494_v31 }
0x1286   :  { %775 = vrot.lane.b32.xlu0 %v1138_v58, %s1343_s2 }
0x128c   :  { %v542_v56 = vpop.permute.xlu2 %541  ;;  %v1068_v59 = vld [vmem:[#allocation3] sm:$0xff] }
0x128d   :  { %544 = vst.msk [vmem:[#allocation3 + $0x8] sm:$0xf] %vm447_vm0, %v542_v56  ;;  %1048 = vmatmul.msk.bf16.vlgmr.msra.gmra.mxu2 %vm400_vm6, %v1068_v59 }
0x128e   :  { %637 = vrot.lane.b32.xlu0 %v1578_v47, %s1351_s20 }
0x1296   :  { %589 = vrot.lane.b32.xlu0 %v1562_v19, %s1351_s20  ;;  %v1106_v19 = vld [vmem:[%s1653_s8] ss:$0 sm:$0xff]  ;;  %s910_s8 = sshll.u32 %s1353_s12, 4  ;;  %s911_s8 = int_to_ptr.vmem [resolvable:$true] %s910_s8 }
0x12f1   :  { %v889_v60 = vpop.permute.xlu1 %888 }
0x12f2   :  { %891 = vst.msk [vmem:[#allocation16] sm:$0xff] %vm400_vm6, %v889_v60 }
0x12f8   :  { %v776_v61 = vpop.permute.xlu0 %775 }
0x12f9   :  { %v778_v12 = vmul.f32 %v776_v61, %v761_v49 }
0x12fb   :  { %v779_v62 = vpack.c.bf16 %v778_v12, %v778_v12  ;;  %883 = vrot.lane.b32.xlu0 %v778_v12, %s1351_s20 }
0x12fd   :  { %781 = vrot.lane.b32.xlu2 %v779_v62, %s1351_s20  ;;  %s898_s20 = sshll.u32 %s1654_s9, 4  ;;  %s899_s20 = int_to_ptr.hbm [resolvable:$true] %s898_s20 }
0x1300   :  { %v638_v34 = vpop.permute.xlu0 %637 }
0x1301   :  { %640 = vst.msk [vmem:[#allocation3 + $0x10] sm:$0xf] %vm447_vm0, %v638_v34 }
0x1308   :  { %v590_v0 = vpop.permute.xlu0 %589  ;;  %v1070_v47 = vld [vmem:[#allocation3 + $0x10] sm:$0xff] }
0x1309   :  { %592 = vst.msk [vmem:[#allocation3 + $0xc] sm:$0xf] %vm447_vm0, %v590_v0  ;;  %1050 = vmatmul.msk.bf16.vlgmr.msra.gmra.mxu3 %vm400_vm6, %v1070_v47 }
0x1310   :  { %v1069_v1 = vld [vmem:[#allocation3 + $0x8] sm:$0xff]  ;;  %v854_v2 = vpop.f32.mrf.mxu2 }
0x1311   :  { %v855_v3 = vadd.f32 %v1106_v19, %v854_v2  ;;  %1049 = vmatmul.msk.bf16.gmra.mxu2 %vm400_vm6, %v1069_v1 }
0x1313   :  { %874 = vst [vmem:[#allocation13] sm:$0xff] %v855_v3 }
0x1318   :  { %v856_v4 = vpop.f32.mrf.mxu2 }
0x1319   :  { %v857_v5 = vadd.f32 %v1106_v19, %v856_v4 }
0x131b   :  { %875 = vst [vmem:[#allocation13 + $0x8] sm:$0xff] %v857_v5 }
0x1357   :  { %v782_v6 = vpop.permute.xlu2 %781 }
0x1358   :  { %784 = vst.msk [vmem:[#allocation3 + $0x1c] sm:$0xf] %vm447_vm0, %v782_v6 }
0x135f   :  { %v1071_v7 = vld [vmem:[#allocation3 + $0x18] sm:$0xff] }
0x1360   :  { %1051 = vmatmul.msk.bf16.gmra.mxu3 %vm400_vm6, %v1071_v7 }
0x136d   :  { %v884_v8 = vpop.permute.xlu0 %883 }
0x136e   :  { %886 = vst.msk [vmem:[#allocation14] sm:$0xff] %vm400_vm6, %v884_v8 }
0x136f   :  { %915 = dma.vmem_to_hbm [thread:$0]  %s911_s8, 128, %s913_s15, [#allocation15]  }
0x1370   :  { %926 = dma.vmem_to_hbm [thread:$0]  %s922_s16, 128, %s924_s1, [#allocation15]  }
0x138c   :  { %v864_v9 = vpop.f32.mrf.mxu3 }
0x138d   :  { %v865_v28 = vadd.f32 %v1106_v19, %v864_v9 }
0x138f   :  { %878 = vst [vmem:[#allocation13 + $0x20] sm:$0xff] %v865_v28 }
0x1394   :  { %v859_v10 = vpop.f32.mrf.mxu2  ;;  %v866_v29 = vpop.f32.mrf.mxu3 }
0x1395   :  { %v860_v11 = vadd.f32 %v1106_v19, %v859_v10  ;;  %v867_v13 = vadd.f32 %v1106_v19, %v866_v29 }
0x1397   :  { %876 = vst [vmem:[#allocation13 + $0x10] sm:$0xff] %v860_v11 }
0x1398   :  { %879 = vst [vmem:[#allocation13 + $0x28] sm:$0xff] %v867_v13 }
0x139c   :  { %v861_v14 = vpop.f32.mrf.mxu2 }
0x139d   :  { %v862_v15 = vadd.f32 %v1106_v19, %v861_v14 }
0x139f   :  { %877 = vst [vmem:[#allocation13 + $0x18] sm:$0xff] %v862_v15 }
0x13e3   :  { %v869_v16 = vpop.f32.mrf.mxu3 }
0x13e4   :  { %v870_v18 = vadd.f32 %v1106_v19, %v869_v16 }
0x13e6   :  { %880 = vst [vmem:[#allocation13 + $0x30] sm:$0xff] %v870_v18 }
0x13eb   :  { %v871_v20 = vpop.f32.mrf.mxu3 }
0x13ec   :  { %v872_v21 = vadd.f32 %v1106_v19, %v871_v20 }
0x13ee   :  { %881 = vst [vmem:[#allocation13 + $0x38] sm:$0xff] %v872_v21 }
0x13ef   :  { %904 = dma.vmem_to_hbm [thread:$0]  %s897_s11, 1024, %s899_s20, [#allocation6], %s1356_s6, %s1356_s6, %s1357_s21  }
0x13f0   :  { %1337 = dma.done.wait [#allocation6], 1024  }
0x13f1   :  { %1338 = vsyncadd [#allocation6], 4294966272 }
0x13f2   :  { %1339 = dma.done.wait [#allocation15], 256  }
0x13f3   :  { %1340 = vsyncadd [#allocation15], 4294967040 }
0x13f4   :  { %939 = vsyncpa [#allocation5], 1 }
0x13f5   :  { %940 = vsyncpa [#allocation8], 1 }
0x13f6   :  { %941 = vsyncpa [#allocation11], 1 }
0x13f7   :  { %942 = vsyncpa [#allocation6], 1 }
0x13f8   :  { %943 = vsyncpa [#allocation15], 1 }

</bundles_post_ra>
